<compile_context>
chip_gen: v5e
topology: v5e:2x2
jax: 0.10.0
libtpu: 0.0.40
codegen_flags: <defaults>
</compile_context>

<pallas_src>
import functools

import jax
import jax.numpy as jnp
from jax.experimental import pallas as pl
from jax.experimental.pallas import tpu as pltpu

EPS = 1e-6  # F.pairwise_distance default eps


def _round_up(x, m):
    return ((x + m - 1) // m) * m


def _sublane_multiple(itemsize):
    # f32 -> 8 sublanes, bf16/f16 -> 16, int8/fp8 -> 32
    return {4: 8, 2: 16, 1: 32}.get(itemsize, 8)


def _vmem_capacity_bytes():
    """Physical VMEM of the current TPU generation; conservative default if unknown."""
    try:
        info = pltpu.get_tpu_info()
        cap = getattr(info, "vmem_capacity_bytes", None)
        if cap:
            return int(cap)
    except Exception:
        pass
    return 64 * 1024 * 1024  # assume the smallest (v7x-like) if the query fails


def _input_tile_bytes(tb, c, thw, itemsize, n_buf):
    """VMEM footprint of the two streamed inputs (r, d) for one grid step, including
    sublane/lane padding of the (C, THW) plane and the pipeline buffers."""
    c_pad = _round_up(c, _sublane_multiple(itemsize))
    thw_pad = _round_up(thw, 128)
    return 2 * n_buf * tb * c_pad * thw_pad * itemsize


def _select_tiling(B, C, HW, itemsize, budget_bytes, min_batch_steps):
    """Pick (Bp, TB, HWp, THW).

    TB must be a multiple of 8 (output block sublanes) or equal the full batch;
    THW must be a multiple of 128 (lane tile) or equal the full spatial extent.
    Batch / spatial zero-padding is introduced only when needed to satisfy those
    constraints within the VMEM budget (padding costs extra HBM bytes)."""

    def batch_cands(bp):
        if bp % 8 == 0:
            return sorted({tb for tb in range(8, bp + 1, 8) if bp % tb == 0},
                          reverse=True)
        return [bp]

    def hw_cands(hwp):
        cands = {hwp}
        if hwp % 128 == 0:
            k = hwp // 128
            cands |= {128 * d for d in range(1, k + 1) if k % d == 0}
        return sorted(cands, reverse=True)

    def best_for(bp, hwp):
        tbs = batch_cands(bp)
        if min_batch_steps > 1:
            restricted = [tb for tb in tbs if bp // tb >= min_batch_steps]
            if restricted:             # cap TB only when a legal smaller tile exists
                tbs = restricted
        best = None
        for thw in hw_cands(hwp):
            for tb in tbs:
                if _input_tile_bytes(tb, C, thw, itemsize, 2) <= budget_bytes:
                    key = (tb * _round_up(thw, 128), thw, tb)   # maximize bytes/step
                    if best is None or key > best:
                        best = key
        return None if best is None else (best[2], best[1])

    got = best_for(B, HW)                       # 1) no padding at all
    if got is not None:
        return B, got[0], HW, got[1]
    bp = _round_up(B, 8)                        # 2) pad batch so TB can drop to 8
    got = best_for(bp, HW)
    if got is not None:
        return bp, got[0], HW, got[1]
    hwp = _round_up(HW, 128)                    # 3) pad HW so it can be split
    got = best_for(bp, hwp)
    if got is not None:
        return bp, got[0], hwp, got[1]
    return bp, (8 if bp % 8 == 0 else bp), hwp, min(hw_cands(hwp))  # best effort


def _fusion_kernel(nc, r_ref, d_ref, w_ref, b_ref, out_ref, acc_ref):
    """Grid = (batch tiles [parallel], HW tiles [arbitrary, reduction]).

    r_ref, d_ref : (TB, C, THW)  native input dtype (f32 or bf16)
    w_ref        : (2, C, 2P)    f32 stacked fused weights
                     w_ref[0] = [ Wr*0.5/HW |  Wr/HW ]   (rgb head)
                     w_ref[1] = [ Wd*0.5/HW | -Wd/HW ]   (depth head)
    b_ref        : (1, 2P)       f32, [ (br+bd)/2 | br-bd+EPS ]  (0 on padded cols)
    out_ref      : (TB, P)       cols [0, nc) = (r_x+d_x)/2 ; col nc = pairwise dist
    acc_ref      : (2, TB, C)    f32 scratch: channel sums accumulated over HW steps
    """
    j = pl.program_id(1)

    @pl.when(j == 0)
    def _():
        acc_ref[...] = jnp.zeros_like(acc_ref)

    # Partial global-sum pool over this HW tile (f32 accumulation; the 1/(H*W) mean
    # scale is folded into the weights).  Pure lane reduce -> XLU.
    acc_ref[0] = acc_ref[0] + jnp.sum(r_ref[...].astype(jnp.float32), axis=-1)
    acc_ref[1] = acc_ref[1] + jnp.sum(d_ref[...].astype(jnp.float32), axis=-1)

    @pl.when(j == pl.num_programs(1) - 1)
    def _():
        TB, P = out_ref.shape
        # Two accumulated MXU dots against the stacked fused weight (K = C each).
        mm = (jnp.dot(acc_ref[0], w_ref[0], preferred_element_type=jnp.float32)
              + jnp.dot(acc_ref[1], w_ref[1], preferred_element_type=jnp.float32)
              + b_ref[...])                                     # (TB, 2P)
        x_blk = mm[:, :P]       # (r_x + d_x)/2  (exactly 0 on padded class columns)
        diff = mm[:, P:]        # r_x - d_x + EPS on real cols, exactly 0 on padding
        dist = jnp.sqrt(jnp.sum(diff * diff, axis=-1, keepdims=True))   # (TB, 1)
        col = jax.lax.broadcasted_iota(jnp.int32, (TB, P), 1)
        # Single unmasked, lane-dense store of the whole output slab.
        out_ref[...] = jnp.where(col == nc, jnp.broadcast_to(dist, (TB, P)), x_blk)


def fusion_forward(r, d, w_r, b_r, w_d, b_d, fusion="add",
                   vmem_budget_bytes=None, vmem_limit_bytes=None):
    """r, d: (B, C, H, W) floats (NCHW, any float dtype).
    Returns (x: (B, NC) f32, distance: (B,) f32)."""
    assert fusion == "add", "only 'add' fusion implemented in the kernel"
    # TODO(synk): fusion='mul' (x = r_x * d_x) path not implemented; module default is 'add'.
    B, C, H, W = r.shape
    C_w, NC = w_r.shape
    assert C_w == C
    HW = H * W
    P = _round_up(NC + 1, 128)          # x in cols [0, NC), distance in col NC
    f32 = jnp.float32
    itemsize = jnp.dtype(r.dtype).itemsize

    # ---- generation-aware budgets ---------------------------------------------------
    vmem_cap = _vmem_capacity_bytes()
    dual_core = vmem_cap <= (80 << 20)        # v7x-like: 64 MiB VMEM/TC, 2 TCs/chip
    if vmem_budget_bytes is None:
        vmem_budget_bytes = (24 << 20) if dual_core else (56 << 20)
    limit_cap = (48 << 20) if dual_core else (100 << 20)
    min_batch_steps = 2 if dual_core else 1

    # ---- tiling ----------------------------------------------------------------------
    Bp, TB, HWp, THW = _select_tiling(B, C, HW, itemsize, vmem_budget_bytes,
                                      min_batch_steps)
    nb, nhw = Bp // TB, HWp // THW

    # Deeper input buffering only on 128-MiB chips with enough grid steps to benefit.
    n_buf = 2
    if (not dual_core and nb * nhw >= 4
            and _input_tile_bytes(TB, C, THW, itemsize, 3) <= vmem_budget_bytes):
        n_buf = 3

    if vmem_limit_bytes is None:
        need = _input_tile_bytes(TB, C, THW, itemsize, n_buf)
        need += 2 * 2 * _round_up(C, 8) * (2 * P) * 4          # stacked weight, 2 bufs
        need += 2 * 8 * (2 * P) * 4                            # bias, 2 bufs
        need += 2 * _round_up(TB, 8) * P * 4                   # output, 2 bufs
        need += 2 * _round_up(TB, 8) * _round_up(C, 128) * 4   # scratch accumulator
        vmem_limit_bytes = max(int(need * 1.25) + (2 << 20), 8 << 20)
        vmem_limit_bytes = min(vmem_limit_bytes, limit_cap)
        vmem_limit_bytes = max(vmem_limit_bytes, need + (1 << 20))  # never below need

    # ---- host-side parameter folding (built once; jit-cacheable in real use) ---------
    inv_hw = 1.0 / HW                 # true spatial size (any padded columns are zeros)
    w_stack = jnp.zeros((2, C, 2 * P), f32)
    w_stack = w_stack.at[0, :, :NC].set(w_r.astype(f32) * (0.5 * inv_hw))
    w_stack = w_stack.at[0, :, P:P + NC].set(w_r.astype(f32) * inv_hw)
    w_stack = w_stack.at[1, :, :NC].set(w_d.astype(f32) * (0.5 * inv_hw))
    w_stack = w_stack.at[1, :, P:P + NC].set(-w_d.astype(f32) * inv_hw)
    b_cat = jnp.zeros((1, 2 * P), f32)
    b_cat = (b_cat.at[0, :NC].set((b_r + b_d).astype(f32) * 0.5)
                  .at[0, P:P + NC].set((b_r - b_d).astype(f32) + EPS))

    # Stream the inputs in their native dtype (no wrapper f32 cast pass).
    r3 = r.reshape(B, C, HW)
    d3 = d.reshape(B, C, HW)
    if Bp != B or HWp != HW:
        pad = ((0, Bp - B), (0, 0), (0, HWp - HW))
        r3 = jnp.pad(r3, pad)
        d3 = jnp.pad(d3, pad)

    def _rd_spec():
        kw = {"pipeline_mode": pl.Buffered(n_buf)} if n_buf != 2 else {}
        return pl.BlockSpec((TB, C, THW), lambda i, j: (i, 0, j), **kw)

    cost = pl.CostEstimate(
        flops=int(2 * Bp * C * HWp + 2 * Bp * (2 * C) * (2 * P)),
        transcendentals=int(Bp),
        bytes_accessed=int(2 * Bp * C * HWp * itemsize + Bp * P * 4
                           + 2 * C * 2 * P * 4 + 2 * P * 4),
    )

    out = pl.pallas_call(
        functools.partial(_fusion_kernel, NC),
        out_shape=jax.ShapeDtypeStruct((Bp, P), f32),
        grid=(nb, nhw),
        in_specs=[
            _rd_spec(),                                            # r tile (pipelined)
            _rd_spec(),                                            # d tile (pipelined)
            pl.BlockSpec((2, C, 2 * P), lambda i, j: (0, 0, 0)),   # stacked fused weight
            pl.BlockSpec((1, 2 * P), lambda i, j: (0, 0)),         # fused bias
        ],
        out_specs=pl.BlockSpec((TB, P), lambda i, j: (i, 0)),
        scratch_shapes=[pltpu.VMEM((2, TB, C), jnp.float32)],
        compiler_params=pltpu.CompilerParams(
            dimension_semantics=("parallel", "arbitrary"),
            vmem_limit_bytes=int(vmem_limit_bytes),
        ),
        cost_estimate=cost,
    )(r3, d3, w_stack, b_cat)

    x = out[:B, :NC]
    dist = out[:B, NC]
    return x, dist


def _reference(r, d, w_r, b_r, w_d, b_d):
    r_feat = jnp.mean(r.astype(jnp.float32), axis=(2, 3))
    d_feat = jnp.mean(d.astype(jnp.float32), axis=(2, 3))
    r_x = r_feat @ w_r + b_r
    d_x = d_feat @ w_d + b_d
    x = (r_x + d_x) / 2.0
    dist = jnp.sqrt(jnp.sum((r_x - d_x + EPS) ** 2, axis=-1))
    return x, dist


if __name__ == "__main__":
    # Small shapes consistent with the module's forward: two NCHW image inputs.
    B, C, H, W = 2, 4, 16, 16
    NUM_CLASSES = 8

    key = jax.random.PRNGKey(0)
    k_r, k_d, k_wr, k_br, k_wd, k_bd = jax.random.split(key, 6)

    r = jax.random.normal(k_r, (B, C, H, W), dtype=jnp.float32)
    d = jax.random.normal(k_d, (B, C, H, W), dtype=jnp.float32)

    # Deterministic synthetic "backbone head" parameters (one per modality).
    w_r = jax.random.normal(k_wr, (C, NUM_CLASSES), dtype=jnp.float32) * 0.1
    b_r = jax.random.normal(k_br, (NUM_CLASSES,), dtype=jnp.float32) * 0.1
    w_d = jax.random.normal(k_wd, (C, NUM_CLASSES), dtype=jnp.float32) * 0.1
    b_d = jax.random.normal(k_bd, (NUM_CLASSES,), dtype=jnp.float32) * 0.1

    x, dist = fusion_forward(r, d, w_r, b_r, w_d, b_d, fusion="add")
    jax.block_until_ready((x, dist))

    x_ref, dist_ref = _reference(r, d, w_r, b_r, w_d, b_d)
    assert x.shape == (B, NUM_CLASSES) and dist.shape == (B,)
    assert jnp.allclose(x, x_ref, atol=1e-5), "fused output mismatch"
    assert jnp.allclose(dist, dist_ref, atol=1e-5), "distance mismatch"

    print("KERNEL_OK")
</pallas_src>

<mosaic_0001>
module attributes {stable_mosaic.version = 11 : i64} {
  func.func @_fusion_kernel(%arg0: i32, %arg1: i32, %arg2: memref<2x4x256xf32, #tpu.memory_space<vmem>>, %arg3: memref<2x4x256xf32, #tpu.memory_space<vmem>>, %arg4: memref<2x4x256xf32, #tpu.memory_space<vmem>>, %arg5: memref<1x256xf32, #tpu.memory_space<vmem>>, %arg6: memref<2x128xf32, #tpu.memory_space<vmem>>, %arg7: memref<2x2x4xf32, #tpu.memory_space<vmem>>) attributes {dimension_semantics = [#tpu.dimension_semantics<parallel>, #tpu.dimension_semantics<arbitrary>], iteration_bounds = array<i64: 1, 1>, scalar_prefetch = 0 : i64, scratch_operands = 1 : i64, tpu.core_type = #tpu.core_type<tc>, window_params = [{transform_indices = @transform_0, window_bounds = array<i64: 2, 4, 256>}, {transform_indices = @transform_1, window_bounds = array<i64: 2, 4, 256>}, {pipeline_mode = #tpu.pipeline_mode<synchronous>, transform_indices = @transform_2, window_bounds = array<i64: 2, 4, 256>}, {pipeline_mode = #tpu.pipeline_mode<synchronous>, transform_indices = @transform_3, window_bounds = array<i64: 1, 256>}, {transform_indices = @transform_4, window_bounds = array<i64: 2, 128>}]} {
    %c0_i32 = arith.constant 0 : i32
    %0 = arith.cmpi eq, %arg1, %c0_i32 : i32
    %1 = arith.extui %0 : i1 to i32
    %c0_i32_0 = arith.constant 0 : i32
    %2 = arith.cmpi ne, %1, %c0_i32_0 : i32
    scf.if %2 {
      %cst_20 = arith.constant 0.000000e+00 : f32
      %22 = vector.broadcast %cst_20 : f32 to vector<2x2x4xf32>
      %c0_21 = arith.constant 0 : index
      %c0_22 = arith.constant 0 : index
      %c0_23 = arith.constant 0 : index
      %23 = vector.load %arg7[%c0_21, %c0_22, %c0_23] : memref<2x2x4xf32, #tpu.memory_space<vmem>>, vector<2x2x4xf32>
      tpu.vector_store %arg7[%c0_21, %c0_22, %c0_23], %22 {strides = array<i32>} : memref<2x2x4xf32, #tpu.memory_space<vmem>>, vector<2x2x4xf32>,
    } else {
    }
    %c0 = arith.constant 0 : index
    %c0_1 = arith.constant 0 : index
    %c0_2 = arith.constant 0 : index
    %3 = vector.load %arg7[%c0, %c0_1, %c0_2] : memref<2x2x4xf32, #tpu.memory_space<vmem>>, vector<1x2x4xf32>
    %4 = vector.shape_cast %3 : vector<1x2x4xf32> to vector<2x4xf32>
    %c0_3 = arith.constant 0 : index
    %c0_4 = arith.constant 0 : index
    %c0_5 = arith.constant 0 : index
    %5 = vector.load %arg2[%c0_3, %c0_4, %c0_5] : memref<2x4x256xf32, #tpu.memory_space<vmem>>, vector<2x4x256xf32>
    %cst = arith.constant dense<0.000000e+00> : vector<2x4xf32>
    %6 = vector.multi_reduction <add>, %5, %cst [2] : vector<2x4x256xf32> to vector<2x4xf32>
    %7 = arith.addf %4, %6 : vector<2x4xf32>
    %c0_6 = arith.constant 0 : index
    %c0_7 = arith.constant 0 : index
    %c0_8 = arith.constant 0 : index
    %8 = vector.load %arg7[%c0_6, %c0_7, %c0_8] : memref<2x2x4xf32, #tpu.memory_space<vmem>>, vector<1x2x4xf32>
    %9 = vector.shape_cast %8 : vector<1x2x4xf32> to vector<2x4xf32>
    %10 = vector.shape_cast %7 : vector<2x4xf32> to vector<1x2x4xf32>
    tpu.vector_store %arg7[%c0_6, %c0_7, %c0_8], %10 {strides = array<i32>} : memref<2x2x4xf32, #tpu.memory_space<vmem>>, vector<1x2x4xf32>,
    %c1 = arith.constant 1 : index
    %c0_9 = arith.constant 0 : index
    %c0_10 = arith.constant 0 : index
    %11 = vector.load %arg7[%c1, %c0_9, %c0_10] : memref<2x2x4xf32, #tpu.memory_space<vmem>>, vector<1x2x4xf32>
    %12 = vector.shape_cast %11 : vector<1x2x4xf32> to vector<2x4xf32>
    %c0_11 = arith.constant 0 : index
    %c0_12 = arith.constant 0 : index
    %c0_13 = arith.constant 0 : index
    %13 = vector.load %arg3[%c0_11, %c0_12, %c0_13] : memref<2x4x256xf32, #tpu.memory_space<vmem>>, vector<2x4x256xf32>
    %cst_14 = arith.constant dense<0.000000e+00> : vector<2x4xf32>
    %14 = vector.multi_reduction <add>, %13, %cst_14 [2] : vector<2x4x256xf32> to vector<2x4xf32>
    %15 = arith.addf %12, %14 : vector<2x4xf32>
    %c1_15 = arith.constant 1 : index
    %c0_16 = arith.constant 0 : index
    %c0_17 = arith.constant 0 : index
    %16 = vector.load %arg7[%c1_15, %c0_16, %c0_17] : memref<2x2x4xf32, #tpu.memory_space<vmem>>, vector<1x2x4xf32>
    %17 = vector.shape_cast %16 : vector<1x2x4xf32> to vector<2x4xf32>
    %18 = vector.shape_cast %15 : vector<2x4xf32> to vector<1x2x4xf32>
    tpu.vector_store %arg7[%c1_15, %c0_16, %c0_17], %18 {strides = array<i32>} : memref<2x2x4xf32, #tpu.memory_space<vmem>>, vector<1x2x4xf32>,
    %c0_i32_18 = arith.constant 0 : i32
    %19 = arith.cmpi eq, %arg1, %c0_i32_18 : i32
    %20 = arith.extui %19 : i1 to i32
    %c0_i32_19 = arith.constant 0 : i32
    %21 = arith.cmpi ne, %20, %c0_i32_19 : i32
    scf.if %21 {
      %c0_20 = arith.constant 0 : index
      %c0_21 = arith.constant 0 : index
      %c0_22 = arith.constant 0 : index
      %22 = vector.load %arg7[%c0_20, %c0_21, %c0_22] : memref<2x2x4xf32, #tpu.memory_space<vmem>>, vector<1x2x4xf32>
      %23 = vector.shape_cast %22 : vector<1x2x4xf32> to vector<2x4xf32>
      %c0_23 = arith.constant 0 : index
      %c0_24 = arith.constant 0 : index
      %c0_25 = arith.constant 0 : index
      %24 = vector.load %arg4[%c0_23, %c0_24, %c0_25] : memref<2x4x256xf32, #tpu.memory_space<vmem>>, vector<1x4x256xf32>
      %25 = vector.shape_cast %24 : vector<1x4x256xf32> to vector<4x256xf32>
      %cst_26 = arith.constant dense<0.000000e+00> : vector<2x256xf32>
      %26 = tpu.matmul %23, %25, %cst_26 {dimension_numbers = #tpu.dot_dimension_numbers<[1], [0], [0], [1], [0, 0, 1, 1], [], []>} : vector<2x4xf32>, vector<4x256xf32>, vector<2x256xf32> -> vector<2x256xf32>
      %c1_27 = arith.constant 1 : index
      %c0_28 = arith.constant 0 : index
      %c0_29 = arith.constant 0 : index
      %27 = vector.load %arg7[%c1_27, %c0_28, %c0_29] : memref<2x2x4xf32, #tpu.memory_space<vmem>>, vector<1x2x4xf32>
      %28 = vector.shape_cast %27 : vector<1x2x4xf32> to vector<2x4xf32>
      %c1_30 = arith.constant 1 : index
      %c0_31 = arith.constant 0 : index
      %c0_32 = arith.constant 0 : index
      %29 = vector.load %arg4[%c1_30, %c0_31, %c0_32] : memref<2x4x256xf32, #tpu.memory_space<vmem>>, vector<1x4x256xf32>
      %30 = vector.shape_cast %29 : vector<1x4x256xf32> to vector<4x256xf32>
      %cst_33 = arith.constant dense<0.000000e+00> : vector<2x256xf32>
      %31 = tpu.matmul %28, %30, %cst_33 {dimension_numbers = #tpu.dot_dimension_numbers<[1], [0], [0], [1], [0, 0, 1, 1], [], []>} : vector<2x4xf32>, vector<4x256xf32>, vector<2x256xf32> -> vector<2x256xf32>
      %32 = arith.addf %26, %31 : vector<2x256xf32>
      %c0_34 = arith.constant 0 : index
      %c0_35 = arith.constant 0 : index
      %33 = vector.load %arg5[%c0_34, %c0_35] : memref<1x256xf32, #tpu.memory_space<vmem>>, vector<1x256xf32>
      %34 = vector.broadcast %33 : vector<1x256xf32> to vector<2x256xf32>
      %35 = arith.addf %32, %34 : vector<2x256xf32>
      %36 = vector.extract_strided_slice %35 {offsets = [0, 0], sizes = [2, 128], strides = [1, 1]} : vector<2x256xf32> to vector<2x128xf32>
      %37 = vector.extract_strided_slice %35 {offsets = [0, 128], sizes = [2, 128], strides = [1, 1]} : vector<2x256xf32> to vector<2x128xf32>
      %38 = arith.mulf %37, %37 : vector<2x128xf32>
      %cst_36 = arith.constant dense<0.000000e+00> : vector<2xf32>
      %39 = vector.multi_reduction <add>, %38, %cst_36 [1] : vector<2x128xf32> to vector<2xf32>
      %40 = vector.shape_cast %39 : vector<2xf32> to vector<2x1xf32>
      %41 = math.sqrt %40 : vector<2x1xf32>
      %42 = tpu.iota {dimensions = array<i32: 1>} : vector<2x128xi32>
      %c8_i32 = arith.constant 8 : i32
      %43 = vector.broadcast %c8_i32 : i32 to vector<2x128xi32>
      %44 = arith.cmpi eq, %42, %43 : vector<2x128xi32>
      %45 = vector.shape_cast %41 : vector<2x1xf32> to vector<2x1xf32>
      %46 = vector.broadcast %45 : vector<2x1xf32> to vector<2x128xf32>
      %47 = arith.select %44, %46, %36 : vector<2x128xi1>, vector<2x128xf32>
      %c0_37 = arith.constant 0 : index
      %c0_38 = arith.constant 0 : index
      %48 = vector.load %arg6[%c0_37, %c0_38] : memref<2x128xf32, #tpu.memory_space<vmem>>, vector<2x128xf32>
      tpu.vector_store %arg6[%c0_37, %c0_38], %47 {strides = array<i32>} : memref<2x128xf32, #tpu.memory_space<vmem>>, vector<2x128xf32>,
    } else {
    }
    return
  }
  func.func @transform_0(%arg0: i32, %arg1: i32) -> (i32, i32, i32) {
    %c0_i32 = arith.constant 0 : i32
    %c0_i32_0 = arith.constant 0 : i32
    return %arg0, %c0_i32, %arg1 : i32, i32, i32
  }
  func.func @transform_1(%arg0: i32, %arg1: i32) -> (i32, i32, i32) {
    %c0_i32 = arith.constant 0 : i32
    %c0_i32_0 = arith.constant 0 : i32
    return %arg0, %c0_i32, %arg1 : i32, i32, i32
  }
  func.func @transform_2(%arg0: i32, %arg1: i32) -> (i32, i32, i32) {
    %c0_i32 = arith.constant 0 : i32
    %c0_i32_0 = arith.constant 0 : i32
    %c0_i32_1 = arith.constant 0 : i32
    %c0_i32_2 = arith.constant 0 : i32
    return %c0_i32, %c0_i32_0, %c0_i32_1 : i32, i32, i32
  }
  func.func @transform_3(%arg0: i32, %arg1: i32) -> (i32, i32) {
    %c0_i32 = arith.constant 0 : i32
    %c0_i32_0 = arith.constant 0 : i32
    %c0_i32_1 = arith.constant 0 : i32
    return %c0_i32, %c0_i32_0 : i32, i32
  }
  func.func @transform_4(%arg0: i32, %arg1: i32) -> (i32, i32) {
    %c0_i32 = arith.constant 0 : i32
    %c0_i32_0 = arith.constant 0 : i32
    return %arg0, %c0_i32 : i32, i32
  }
}

</mosaic_0001>

<bundles_post_ra>
// kernel: tpu_custom_call.1
= control target key start
LH: loop header
LB: loop body
LE: loop exit
PB: predicated region body
PF: predicated region fallthrough
CT: control target
= control target key end

     0   :  { %9 = vsyncpa [#allocation4], 0  ;;  %s485_s0 = inlined_call_operand.hbm [shape: f32[2,4,256], index: 0, kind: input, shape index: {}]   ;;  %s486_s1 = inlined_call_operand.hbm [shape: f32[2,4,256], index: 1, kind: input, shape index: {}]   ;;  %s487_s2 = inlined_call_operand.hbm [shape: f32[2,4,256], index: 2, kind: input, shape index: {}]   ;;  %s488_s3 = inlined_call_operand.vmem [shape: f32[1,256], index: 3, kind: input, shape index: {}]   ;;  %s489_s4 = inlined_call_operand.hbm [shape: f32[2,128], index: 4, kind: output, shape index: {}]  }
   0x1   :  { %10 = vsyncpa [#allocation7], 0 }
   0x2   :  { %11 = vsyncpa [#allocation5], 0  ;;  %s29_s17 = sshll.u32 %s486_s1, 4  ;;  %s422_s18 = smov [#allocation6]   ;;  %s30_s17 = int_to_ptr.hbm [resolvable:$true] %s29_s17 }
   0x3   :  { %s31_s19 = sshll.u32 %s422_s18, 4  ;;  %s16_s22 = sshll.u32 %s485_s0, 4  ;;  %s32_s19 = int_to_ptr.vmem [resolvable:$true] %s31_s19  ;;  %s17_s22 = int_to_ptr.hbm [resolvable:$true] %s16_s22 }
   0x4   :  { %s423_s23 = smov 128   ;;  %s424_s24 = smov 8  }
   0x5   :  { %37 = dma.hbm_to_vmem [thread:$0]  %s30_s17, 256, %s32_s19, [#allocation7], %s423_s23, %s423_s23, %s424_s24  }
   0x6   :  { %s425_s25 = smov [#allocation3]   ;;  %s42_s29 = sshll.u32 %s487_s2, 4  ;;  %s43_s29 = int_to_ptr.hbm [resolvable:$true] %s42_s29 }
   0x7   :  { %s18_s26 = sshll.u32 %s425_s25, 4  ;;  %s426_s1 = smov [#allocation8]   ;;  %s19_s26 = int_to_ptr.vmem [resolvable:$true] %s18_s26 }
   0x8   :  { %24 = dma.hbm_to_vmem [thread:$0]  %s17_s22, 256, %s19_s26, [#allocation4], %s423_s23, %s423_s23, %s424_s24  }
   0x9   :  { %s44_s30 = sshll.u32 %s426_s1, 4  ;;  %s45_s30 = int_to_ptr.vmem [resolvable:$true] %s44_s30 }
   0xa   :  { %50 = dma.hbm_to_vmem [thread:$0]  %s43_s29, 256, %s45_s30, [#allocation7], %s423_s23, %s423_s23, %s424_s24  }
   0xb   :  { %416 = dma.done.wait [#allocation4], 256  }
   0xc   :  { %417 = vsyncadd [#allocation4], 4294967040 }
   0xd   :  { %418 = dma.done.wait [#allocation7], 512  }
   0xe   :  { %419 = vsyncadd [#allocation7], 4294966784  ;;  %v73_v0 = vld [vmem:[#allocation3] sm:$0xff]  ;;  %v74_v1 = vld [vmem:[#allocation3 + $0x8] sm:$0xff]  ;;  %vm88_vm0 = vcmask 1043456   ;;  %vm69_vm1 = vcmask 25600   ;;  %v101_v32 = vlaneseq }
   0xf   :  { %77 = vst [vmem:[#allocation1] ss:$2 sm:$0xff] %v73_v0  ;;  %v113_v2 = vld [vmem:[#allocation6] sm:$0xff]  ;;  %v114_v3 = vld [vmem:[#allocation6 + $0x8] sm:$0xff]  ;;  %v153_v13 = vld [vmem:[#allocation8 + $0x8] sm:$0xff]  ;;  %v427_v28 = vmov 0.0  }
  0x10   :  { %81 = vst [vmem:[#allocation1 + $0x10] ss:$2 sm:$0xff] %v74_v1  ;;  %v150_v24 = vld [vmem:[#allocation8] sm:$0xff]  ;;  %v102_v33 = vand.u32 127, %v101_v32  ;;  %vm105_vm2 = vcmask 1041409   ;;  %vm158_vm3 = vcmask 31744  }
  0x11   :  { %70 = vst.msk [vmem:[#allocation2] sm:$0x3] %vm69_vm1, %v427_v28  ;;  %v257_v49 = vld [vmem:[%s488_s3] sm:$0x3]  ;;  %vm266_vm4 = vcmask 1041408   ;;  %s428_s3 = smov [#allocation9]  }
  0x12   :  { %71 = vst.msk [vmem:[#allocation2 + $0x2] sm:$0x3] %vm69_vm1, %v427_v28  ;;  %v260_v50 = vperm.slane %v257_v49, 1  ;;  %s290_s5 = sshll.u32 %s428_s3, 4  ;;  %s292_s8 = sshll.u32 %s489_s4, 4  ;;  %vm282_vm6 = vcmp.eq.s32.totalorder %v102_v33, 8  ;;  %s291_s5 = int_to_ptr.vmem [resolvable:$true] %s290_s5  ;;  %s293_s8 = int_to_ptr.hbm [resolvable:$true] %s292_s8 }
  0x16   :  { %v78_v4 = vld.sshfl [vmem:[#allocation1] sm:$0xff pattern:$0x75316420]  ;;  %v79_v5 = vld.sshfl [vmem:[#allocation1 + $0x8] sm:$0xff pattern:$0x75316420] }
  0x17   :  { %v89_v6 = vsel %vm88_vm0, %v78_v4, 0.0  ;;  %v90_v7 = vsel %vm88_vm0, %v79_v5, 0.0  ;;  %117 = vst [vmem:[#allocation1] ss:$2 sm:$0xff] %v113_v2  ;;  %v259_v2 = vperm.slane %v257_v49, 0 }
  0x18   :  { %v91_v8 = vadd.f32 %v90_v7, %v89_v6  ;;  %v82_v9 = vld.sshfl [vmem:[#allocation1 + $0x10] sm:$0xff pattern:$0x75316420]  ;;  %v83_v10 = vld.sshfl [vmem:[#allocation1 + $0x18] sm:$0xff pattern:$0x75316420] }
  0x19   :  { %121 = vst [vmem:[#allocation1 + $0x10] ss:$2 sm:$0xff] %v114_v3  ;;  %v94_v11 = vsel %vm88_vm0, %v82_v9, 0.0  ;;  %v95_v12 = vsel %vm88_vm0, %v83_v10, 0.0  ;;  %v72_v37 = vld [vmem:[#allocation2] sm:$0x3] }
  0x1a   :  { %92 = vadd.xlane.f32.xlu0 %v91_v8  ;;  %v96_v16 = vadd.f32 %v95_v12, %v94_v11  ;;  %v112_v43 = vld [vmem:[#allocation2 + $0x2] sm:$0x3] }
  0x1e   :  { %v118_v14 = vld.sshfl [vmem:[#allocation1] sm:$0xff pattern:$0x75316420]  ;;  %v119_v15 = vld.sshfl [vmem:[#allocation1 + $0x8] sm:$0xff pattern:$0x75316420] }
  0x1f   :  { %v128_v17 = vsel %vm88_vm0, %v118_v14, 0.0  ;;  %v129_v18 = vsel %vm88_vm0, %v119_v15, 0.0  ;;  %155 = vst [vmem:[#allocation1] ss:$2 sm:$0xff] %v153_v13 }
  0x20   :  { %v130_v19 = vadd.f32 %v129_v18, %v128_v17  ;;  %v122_v20 = vld.sshfl [vmem:[#allocation1 + $0x10] sm:$0xff pattern:$0x75316420]  ;;  %v123_v21 = vld.sshfl [vmem:[#allocation1 + $0x18] sm:$0xff pattern:$0x75316420] }
  0x21   :  { %v133_v22 = vsel %vm88_vm0, %v122_v20, 0.0  ;;  %v134_v23 = vsel %vm88_vm0, %v123_v21, 0.0 }
  0x22   :  { %131 = vadd.xlane.f32.xlu1 %v130_v19  ;;  %97 = vadd.xlane.f32.xlu0 %v96_v16  ;;  %v135_v27 = vadd.f32 %v134_v23, %v133_v22 }
  0x26   :  { %v156_v25 = vld.sshfl [vmem:[#allocation1] sm:$0xff pattern:$0x75316420]  ;;  %v157_v26 = vld.sshfl [vmem:[#allocation1 + $0x8] sm:$0xff pattern:$0x75316420] }
  0x27   :  { %207 = vst [vmem:[#allocation1] ss:$2 sm:$0xff] %v150_v24  ;;  %303 = vmatpush.msk.msra.mxu0 %vm88_vm0, %v156_v25  ;;  %305 = vmatpush.msk.msra.mxu1 %vm88_vm0, %v157_v26 }
  0x2a   :  { %136 = vadd.xlane.f32.xlu1 %v135_v27 }
  0x2e   :  { %v208_v29 = vld.sshfl [vmem:[#allocation1] sm:$0xff pattern:$0x75316420]  ;;  %v209_v30 = vld.sshfl [vmem:[#allocation1 + $0x8] sm:$0xff pattern:$0x75316420] }
  0x2f   :  { %307 = vmatpush.msk.msra.mxu2 %vm88_vm0, %v208_v29  ;;  %309 = vmatpush.msk.msra.mxu3 %vm88_vm0, %v209_v30 }
  0x8d   :  { %v93_v31 = vpop.xlane.xlu0 %92 }
  0x8e   :  { %v103_v36 = vperm.slane %v93_v31, %v102_v33 }
  0x95   :  { %v132_v34 = vpop.xlane.xlu1 %131  ;;  %v98_v35 = vpop.xlane.xlu0 %97 }
  0x96   :  { %v104_v38 = vperm.slane %v98_v35, %v102_v33  ;;  %v140_v42 = vperm.slane %v132_v34, %v102_v33 }
  0x98   :  { %v106_v39 = vsel %vm105_vm2, %v104_v38, %v103_v36 }
  0x99   :  { %v108_v40 = vadd.f32 %v106_v39, %v72_v37 }
  0x9b   :  { %110 = vst.msk [vmem:[#allocation2] sm:$0x3] %vm69_vm1, %v108_v40 }
  0x9d   :  { %v137_v41 = vpop.xlane.xlu1 %136 }
  0x9e   :  { %v141_v44 = vperm.slane %v137_v41, %v102_v33 }
  0xa0   :  { %v142_v45 = vsel %vm105_vm2, %v141_v44, %v140_v42 }
  0xa1   :  { %v144_v46 = vadd.f32 %v142_v45, %v112_v43 }
  0xa2   :  { %v149_v47 = vld [vmem:[#allocation2] sm:$0x3] }
  0xa3   :  { %145 = vst.msk [vmem:[#allocation2 + $0x2] sm:$0x3] %vm69_vm1, %v144_v46  ;;  %308 = vmatmul.msk.f32.vlgmr.msra.gmra.mxu2 %vm158_vm3, %v149_v47  ;;  %310 = vmatmul.msk.f32.vlgmr.msra.gmra.mxu3 %vm158_vm3, %v149_v47 }
  0xaa   :  { %v151_v48 = vld [vmem:[#allocation2 + $0x2] sm:$0x3] }
  0xab   :  { %304 = vmatmul.msk.f32.vlgmr.msra.gmra.mxu0 %vm158_vm3, %v151_v48  ;;  %306 = vmatmul.msk.f32.vlgmr.msra.gmra.mxu1 %vm158_vm3, %v151_v48 }
 0x126   :  { %v254_v51 = vpop.f32.mrf.mxu3  ;;  %v234_v0 = vpop.f32.mrf.mxu2 }
 0x128   :  { %v203_v52 = vpop.f32.mrf.mxu1  ;;  %v183_v62 = vpop.f32.mrf.mxu0 }
 0x129   :  { %v255_v53 = vadd.f32 %v254_v51, %v203_v52  ;;  %v235_v1 = vadd.f32 %v234_v0, %v183_v62 }
 0x12b   :  { %v264_v54 = vadd.f32 %v260_v50, %v255_v53  ;;  %v263_v6 = vadd.f32 %v259_v2, %v235_v1 }
 0x12d   :  { %v265_v55 = vmul.f32 %v264_v54, %v264_v54 }
 0x12f   :  { %v267_v56 = vsel %vm266_vm4, %v265_v55, 0.0 }
 0x130   :  { %268 = vadd.xlane.f32.xlu2 %v267_v56 }
 0x1a3   :  { %v269_v57 = vpop.xlane.xlu2 %268 }
 0x1a4   :  { %318 = vrsqrt.f32 %v269_v57  ;;  %vm277_vm5 = vcmp.eq.f32.partialorder %v269_v57, inf  ;;  %v280_v5 = vand.u32 2147483648, %v269_v57  ;;  %vm279_vm7 = vcmp.eq.f32.partialorder %v269_v57, 0.0 }
 0x1aa   :  { %v319_v58 = vpop.eup %318 }
 0x1ab   :  { %v271_v59 = vmul.f32 %v319_v58, %v269_v57 }
 0x1ad   :  { %v272_v60 = vmul.f32 %v319_v58, %v271_v59 }
 0x1af   :  { %v273_v61 = vmul.f32 0.5, %v272_v60 }
 0x1b1   :  { %v274_v63 = vsub.f32 1.5, %v273_v61 }
 0x1b3   :  { %v275_v3 = vmul.f32 %v319_v58, %v274_v63 }
 0x1b5   :  { %v276_v4 = vmul.f32 %v275_v3, %v269_v57 }
 0x1b7   :  { %v278_v7 = vsel %vm277_vm5, %v269_v57, %v276_v4 }
 0x1b8   :  { %v281_v8 = vsel %vm279_vm7, %v280_v5, %v278_v7 }
 0x1b9   :  { %v283_v9 = vsel %vm282_vm6, %v281_v8, %v263_v6 }
 0x1ba   :  { %284 = vst [vmem:[#allocation9] sm:$0x3] %v283_v9 }
 0x1bb   :  { %295 = dma.vmem_to_hbm [thread:$0]  %s291_s5, 32, %s293_s8, [#allocation5]  }
 0x1bc   :  { %420 = dma.done.wait [#allocation5], 32  }
 0x1bd   :  { %421 = vsyncadd [#allocation5], 4294967264 }
 0x1be   :  { %300 = vsyncpa [#allocation4], 1 }
 0x1bf   :  { %301 = vsyncpa [#allocation7], 1 }
 0x1c0   :  { %302 = vsyncpa [#allocation5], 1 }

</bundles_post_ra>
